<compile_context>
chip_gen: v7x
topology: tpu7x:2x2x1
jax: 0.10.0
libtpu: 0.0.40
codegen_flags: <defaults>
</compile_context>

<pallas_src>
import jax
import jax.numpy as jnp
from jax.experimental import pallas as pl
from jax.experimental.pallas import tpu as pltpu


def _round_up(x, m):
    return (x + m - 1) // m * m


def _ffn_kernel(x_ref, w1_ref, b1_ref, w2_ref, b2_ref, o_ref, acc_ref):
    # Per grid step (i, f):
    #   x_ref:  (tm, d_model)     w1_ref: (d_model, tf)   b1_ref: (1, tf)
    #   w2_ref: (tf, d_model)     b2_ref: (1, d_model)
    #   o_ref:  (tm, d_model)     acc_ref: (tm, d_model) f32 scratch
    ff = pl.program_id(1)

    @pl.when(ff == 0)
    def _init():
        # Start the accumulator at the second-layer bias.
        acc_ref[...] = jnp.broadcast_to(
            b2_ref[...].astype(jnp.float32), acc_ref.shape)

    # First matmul on this d_ff slab (MXU, f32 accumulation).
    x = x_ref[...].astype(w1_ref.dtype)
    h = jnp.dot(x, w1_ref[...], preferred_element_type=jnp.float32)
    h = jnp.maximum(h + b1_ref[...].astype(jnp.float32), 0.0)  # bias + ReLU in f32

    # Second matmul: this slab's contribution to the output rows.
    acc_ref[...] += jnp.dot(h.astype(w2_ref.dtype), w2_ref[...],
                            preferred_element_type=jnp.float32)

    @pl.when(ff == pl.num_programs(1) - 1)
    def _finalize():
        o_ref[...] = acc_ref[...].astype(o_ref.dtype)


def position_wise_ffn(x, w1, b1, w2, b2, *, tm=256, tf=512):
    """y = relu(x @ w1 + b1) @ w2 + b2.

    x:  [B, S, d_model]                   (output matches x.dtype)
    w1: [d_model, d_ff], b1: [d_ff]       (transposed vs. PyTorch's weight)
    w2: [d_ff, d_model], b2: [d_model]
    w1/w2 may be bfloat16; accumulation is always f32.
    """
    B, S, d_model = x.shape
    d_ff = w1.shape[1]
    M = B * S

    # ---- Tile selection ----------------------------------------------------
    # Row tile: as large as requested, but never larger than the 8-aligned row
    # count; rows are zero-padded up to a tile multiple (sliced off at the end).
    tm = max(8, _round_up(min(tm, _round_up(M, 8)), 8))
    m_pad = _round_up(M, tm)
    # d_ff slab: must be a 128-multiple that divides d_ff, else use full d_ff.
    if tf <= 0 or tf % 128 != 0 or d_ff % tf != 0:
        tf = d_ff

    # ---- Reshape / pad inputs ----------------------------------------------
    x2d = x.reshape(M, d_model)
    if m_pad != M:
        x2d = jnp.pad(x2d, ((0, m_pad - M), (0, 0)))
    b1_2d = b1.reshape(1, d_ff)
    b2_2d = b2.reshape(1, d_model)

    # ---- VMEM budget (double-buffered inputs/outputs + scratch) -------------
    isz = lambda a: jnp.dtype(a.dtype).itemsize
    vmem_need = (
        2 * tm * d_model * isz(x2d)              # x tile
        + 2 * (d_model + 1) * tf * isz(w1)       # W1 + b1 slabs
        + 2 * (tf + 1) * d_model * isz(w2)       # W2 slab + b2
        + 2 * tm * d_model * isz(x2d)            # out tile
        + tm * d_model * 4                       # f32 accumulator
        + tm * tf * 4                            # f32 intermediate h
    )
    vmem_limit = int(min(max(32 * 1024 * 1024, 2 * vmem_need),
                         120 * 1024 * 1024))

    # ---- Cost hint for XLA ---------------------------------------------------
    flops = 4 * m_pad * d_model * d_ff
    bytes_accessed = (x2d.size * isz(x2d) + w1.size * isz(w1)
                      + b1.size * isz(b1) + w2.size * isz(w2)
                      + b2.size * isz(b2) + m_pad * d_model * isz(x2d))
    cost = pl.CostEstimate(flops=flops, transcendentals=0,
                           bytes_accessed=bytes_accessed)

    out2d = pl.pallas_call(
        _ffn_kernel,
        out_shape=jax.ShapeDtypeStruct((m_pad, d_model), x.dtype),
        grid_spec=pltpu.PrefetchScalarGridSpec(
            num_scalar_prefetch=0,
            grid=(m_pad // tm, d_ff // tf),          # rows parallel, d_ff reduction last
            in_specs=[
                pl.BlockSpec((tm, d_model), lambda i, f: (i, 0)),   # x rows
                pl.BlockSpec((d_model, tf), lambda i, f: (0, f)),   # W1 slab
                pl.BlockSpec((1, tf), lambda i, f: (0, f)),         # b1 slab
                pl.BlockSpec((tf, d_model), lambda i, f: (f, 0)),   # W2 slab
                pl.BlockSpec((1, d_model), lambda i, f: (0, 0)),    # b2
            ],
            out_specs=pl.BlockSpec((tm, d_model), lambda i, f: (i, 0)),
            scratch_shapes=[pltpu.VMEM((tm, d_model), jnp.float32)],
        ),
        compiler_params=pltpu.CompilerParams(
            dimension_semantics=("parallel", "arbitrary"),
            vmem_limit_bytes=vmem_limit,
        ),
        cost_estimate=cost,
    )(x2d, w1, b1_2d, w2, b2_2d)

    if m_pad != M:
        out2d = out2d[:M]
    return out2d.reshape(B, S, d_model)


def init_params(key, d_model, d_ff, dtype=jnp.float32):
    """Deterministic init mimicking nn.Linear (uniform(-1/sqrt(fan_in), +))."""
    k1, k2, k3, k4 = jax.random.split(key, 4)
    lim1 = 1.0 / (d_model ** 0.5)
    lim2 = 1.0 / (d_ff ** 0.5)
    # stored as [in, out] (i.e. transpose of PyTorch's weight layout)
    w1 = jax.random.uniform(k1, (d_model, d_ff), dtype, -lim1, lim1)
    b1 = jax.random.uniform(k2, (d_ff,), dtype, -lim1, lim1)
    w2 = jax.random.uniform(k3, (d_ff, d_model), dtype, -lim2, lim2)
    b2 = jax.random.uniform(k4, (d_model,), dtype, -lim2, lim2)
    return w1, b1, w2, b2


if __name__ == "__main__":
    # Small shapes consistent with the module.  S=9 deliberately exercises the
    # row-padding path; d_ff=1024 with tf=512 exercises the streamed d_ff
    # accumulation (2 slabs).
    B, S, d_model, d_ff = 2, 9, 128, 1024

    key = jax.random.PRNGKey(0)
    kx, kp = jax.random.split(key)
    x = jax.random.normal(kx, (B, S, d_model), jnp.float32)
    w1, b1, w2, b2 = init_params(kp, d_model, d_ff)

    # 1) f32 weights: tight check against the pure-JAX reference.
    out = jax.block_until_ready(position_wise_ffn(x, w1, b1, w2, b2))
    ref = jnp.maximum(x @ w1 + b1, 0.0) @ w2 + b2
    assert out.shape == (B, S, d_model)
    assert jnp.allclose(out, ref, atol=1e-4, rtol=1e-4)

    # 2) bf16 weights (half the weight DMA, 2x MXU throughput on v6e/v7x),
    #    f32 accumulation.  Compared against a reference that applies the same
    #    bf16 casts (standard mixed-precision trade-off).
    w1b, w2b = w1.astype(jnp.bfloat16), w2.astype(jnp.bfloat16)
    out_bf16 = jax.block_until_ready(position_wise_ffn(x, w1b, b1, w2b, b2))
    h_ref = jnp.maximum(
        jnp.dot(x.astype(jnp.bfloat16), w1b,
                preferred_element_type=jnp.float32) + b1, 0.0)
    ref_bf16 = jnp.dot(h_ref.astype(jnp.bfloat16), w2b,
                       preferred_element_type=jnp.float32) + b2
    assert out_bf16.shape == (B, S, d_model)
    assert jnp.allclose(out_bf16, ref_bf16, atol=2e-2, rtol=2e-2)

    print("KERNEL_OK")
</pallas_src>

<mosaic_0001>
module attributes {stable_mosaic.version = 11 : i64} {
  func.func @_ffn_kernel(%arg0: i32, %arg1: i32, %arg2: memref<24x128xf32, #tpu.memory_space<vmem>>, %arg3: memref<128x512xf32, #tpu.memory_space<vmem>>, %arg4: memref<1x512xf32, #tpu.memory_space<vmem>>, %arg5: memref<512x128xf32, #tpu.memory_space<vmem>>, %arg6: memref<1x128xf32, #tpu.memory_space<vmem>>, %arg7: memref<24x128xf32, #tpu.memory_space<vmem>>, %arg8: memref<24x128xf32, #tpu.memory_space<vmem>>) attributes {dimension_semantics = [#tpu.dimension_semantics<parallel>, #tpu.dimension_semantics<arbitrary>], iteration_bounds = array<i64: 1, 2>, scalar_prefetch = 0 : i64, scratch_operands = 1 : i64, tpu.core_type = #tpu.core_type<tc>, window_params = [{transform_indices = @transform_0, window_bounds = array<i64: 24, 128>}, {transform_indices = @transform_1, window_bounds = array<i64: 128, 512>}, {transform_indices = @transform_2, window_bounds = array<i64: 1, 512>}, {transform_indices = @transform_3, window_bounds = array<i64: 512, 128>}, {pipeline_mode = #tpu.pipeline_mode<synchronous>, transform_indices = @transform_4, window_bounds = array<i64: 1, 128>}, {transform_indices = @transform_5, window_bounds = array<i64: 24, 128>}]} {
    %c0_i32 = arith.constant 0 : i32
    %0 = arith.cmpi eq, %arg1, %c0_i32 : i32
    %1 = arith.extui %0 : i1 to i32
    %c0_i32_0 = arith.constant 0 : i32
    %2 = arith.cmpi ne, %1, %c0_i32_0 : i32
    scf.if %2 {
      %c0_15 = arith.constant 0 : index
      %c0_16 = arith.constant 0 : index
      %19 = vector.load %arg6[%c0_15, %c0_16] : memref<1x128xf32, #tpu.memory_space<vmem>>, vector<1x128xf32>
      %20 = vector.shape_cast %19 : vector<1x128xf32> to vector<1x128xf32>
      %21 = vector.broadcast %20 : vector<1x128xf32> to vector<24x128xf32>
      %c0_17 = arith.constant 0 : index
      %c0_18 = arith.constant 0 : index
      %22 = vector.load %arg8[%c0_17, %c0_18] : memref<24x128xf32, #tpu.memory_space<vmem>>, vector<24x128xf32>
      tpu.vector_store %arg8[%c0_17, %c0_18], %21 {strides = array<i32>} : memref<24x128xf32, #tpu.memory_space<vmem>>, vector<24x128xf32>,
    } else {
    }
    %c0 = arith.constant 0 : index
    %c0_1 = arith.constant 0 : index
    %3 = vector.load %arg2[%c0, %c0_1] : memref<24x128xf32, #tpu.memory_space<vmem>>, vector<24x128xf32>
    %c0_2 = arith.constant 0 : index
    %c0_3 = arith.constant 0 : index
    %4 = vector.load %arg3[%c0_2, %c0_3] : memref<128x512xf32, #tpu.memory_space<vmem>>, vector<128x512xf32>
    %cst = arith.constant dense<0.000000e+00> : vector<24x512xf32>
    %5 = tpu.matmul %3, %4, %cst {dimension_numbers = #tpu.dot_dimension_numbers<[1], [0], [0], [1], [0, 0, 1, 1], [], []>} : vector<24x128xf32>, vector<128x512xf32>, vector<24x512xf32> -> vector<24x512xf32>
    %c0_4 = arith.constant 0 : index
    %c0_5 = arith.constant 0 : index
    %6 = vector.load %arg4[%c0_4, %c0_5] : memref<1x512xf32, #tpu.memory_space<vmem>>, vector<1x512xf32>
    %7 = vector.broadcast %6 : vector<1x512xf32> to vector<24x512xf32>
    %8 = arith.addf %5, %7 : vector<24x512xf32>
    %cst_6 = arith.constant 0.000000e+00 : f32
    %9 = vector.broadcast %cst_6 : f32 to vector<24x512xf32>
    %10 = arith.maximumf %8, %9 : vector<24x512xf32>
    %c0_7 = arith.constant 0 : index
    %c0_8 = arith.constant 0 : index
    %11 = vector.load %arg8[%c0_7, %c0_8] : memref<24x128xf32, #tpu.memory_space<vmem>>, vector<24x128xf32>
    %c0_9 = arith.constant 0 : index
    %c0_10 = arith.constant 0 : index
    %12 = vector.load %arg5[%c0_9, %c0_10] : memref<512x128xf32, #tpu.memory_space<vmem>>, vector<512x128xf32>
    %cst_11 = arith.constant dense<0.000000e+00> : vector<24x128xf32>
    %13 = tpu.matmul %10, %12, %cst_11 {dimension_numbers = #tpu.dot_dimension_numbers<[1], [0], [0], [1], [0, 0, 1, 1], [], []>} : vector<24x512xf32>, vector<512x128xf32>, vector<24x128xf32> -> vector<24x128xf32>
    %14 = arith.addf %11, %13 : vector<24x128xf32>
    %c0_12 = arith.constant 0 : index
    %c0_13 = arith.constant 0 : index
    %15 = vector.load %arg8[%c0_12, %c0_13] : memref<24x128xf32, #tpu.memory_space<vmem>>, vector<24x128xf32>
    tpu.vector_store %arg8[%c0_12, %c0_13], %14 {strides = array<i32>} : memref<24x128xf32, #tpu.memory_space<vmem>>, vector<24x128xf32>,
    %c1_i32 = arith.constant 1 : i32
    %16 = arith.cmpi eq, %arg1, %c1_i32 : i32
    %17 = arith.extui %16 : i1 to i32
    %c0_i32_14 = arith.constant 0 : i32
    %18 = arith.cmpi ne, %17, %c0_i32_14 : i32
    scf.if %18 {
      %c0_15 = arith.constant 0 : index
      %c0_16 = arith.constant 0 : index
      %19 = vector.load %arg8[%c0_15, %c0_16] : memref<24x128xf32, #tpu.memory_space<vmem>>, vector<24x128xf32>
      %c0_17 = arith.constant 0 : index
      %c0_18 = arith.constant 0 : index
      %20 = vector.load %arg7[%c0_17, %c0_18] : memref<24x128xf32, #tpu.memory_space<vmem>>, vector<24x128xf32>
      tpu.vector_store %arg7[%c0_17, %c0_18], %19 {strides = array<i32>} : memref<24x128xf32, #tpu.memory_space<vmem>>, vector<24x128xf32>,
    } else {
    }
    return
  }
  func.func @transform_0(%arg0: i32, %arg1: i32) -> (i32, i32) {
    %c0_i32 = arith.constant 0 : i32
    %c0_i32_0 = arith.constant 0 : i32
    return %arg0, %c0_i32 : i32, i32
  }
  func.func @transform_1(%arg0: i32, %arg1: i32) -> (i32, i32) {
    %c0_i32 = arith.constant 0 : i32
    %c0_i32_0 = arith.constant 0 : i32
    return %c0_i32, %arg1 : i32, i32
  }
  func.func @transform_2(%arg0: i32, %arg1: i32) -> (i32, i32) {
    %c0_i32 = arith.constant 0 : i32
    %c0_i32_0 = arith.constant 0 : i32
    return %c0_i32, %arg1 : i32, i32
  }
  func.func @transform_3(%arg0: i32, %arg1: i32) -> (i32, i32) {
    %c0_i32 = arith.constant 0 : i32
    %c0_i32_0 = arith.constant 0 : i32
    return %arg1, %c0_i32 : i32, i32
  }
  func.func @transform_4(%arg0: i32, %arg1: i32) -> (i32, i32) {
    %c0_i32 = arith.constant 0 : i32
    %c0_i32_0 = arith.constant 0 : i32
    %c0_i32_1 = arith.constant 0 : i32
    return %c0_i32, %c0_i32_0 : i32, i32
  }
  func.func @transform_5(%arg0: i32, %arg1: i32) -> (i32, i32) {
    %c0_i32 = arith.constant 0 : i32
    %c0_i32_0 = arith.constant 0 : i32
    return %arg0, %c0_i32 : i32, i32
  }
}

</mosaic_0001>

<bundles_post_ra>
// kernel: tpu_custom_call.1
= control target key start
LH: loop header
LB: loop body
LE: loop exit
PB: predicated region body
PF: predicated region fallthrough
CT: control target
= control target key end

     0   :  { %s2000_s0 = inlined_call_operand.hbm [shape: f32[24,128], index: 0, kind: input, shape index: {}]   ;;  %s2001_s1 = inlined_call_operand.hbm [shape: f32[128,1024], index: 1, kind: input, shape index: {}]   ;;  %s2002_s2 = inlined_call_operand.hbm [shape: f32[1,1024], index: 2, kind: input, shape index: {}]   ;;  %s2003_s3 = inlined_call_operand.hbm [shape: f32[1024,128], index: 3, kind: input, shape index: {}]   ;;  %s2004_s4 = inlined_call_operand.vmem [shape: f32[1,128], index: 4, kind: input, shape index: {}]   ;;  %s2005_s5 = inlined_call_operand.hbm [shape: f32[24,128], index: 5, kind: output, shape index: {}]  }
   0x1   :  { %2015 = sst [smem:[#allocation18_spill]] %s2001_s1 }
   0x2   :  { %10 = vsyncpa [#allocation4], 0 }
   0x3   :  { %11 = vsyncpa [#allocation7], 0 }
   0x4   :  { %13 = vsyncpa [#allocation7 + $0x1], 0 }
   0x5   :  { %14 = vsyncpa [#allocation10], 0 }
   0x6   :  { %16 = vsyncpa [#allocation10 + $0x1], 0 }
   0x7   :  { %17 = vsyncpa [#allocation5], 0  ;;  %s1585_s18 = smov 0   ;;  %s1587_s19 = smov 0  }
   0x8   :  { %s1589_s20 = smov 0   ;;  %s1591_s21 = smov 0  }
   0x9   :  { %s1593_s22 = smov 0   ;;  %s1595_s23 = smov 0  }
   0xa LB: > { %s32_s24 = sadd.s32 1, %s1536_s22  ;;  %s68_s25 = sadd.s32 1, %s1528_s20  ;;  %s1540_s23 = sphi %s1595_s23, %s23_s23   ;;  %s1536_s22 = sphi %s1593_s22, %s2037_s22   ;;  %s1532_s21 = sphi %s1591_s21, %s2036_s21   ;;  %s1528_s20 = sphi %s1589_s20, %s2035_s20   ;;  %s1524_s19 = sphi %s1587_s19, %s2034_s19   ;;  %s1520_s18 = sphi %s1585_s18, %s2033_s18  }
   0xb   : > { %p33_p0 = scmp.ge.s32.totalorder %s32_s24, 2  ;;  %p75_p1 = scmp.ne.s32.totalorder %s1528_s20, %s1524_s19 }
   0xc   : > { %p76_p2 = scmp.eq.s32.totalorder %s1540_s23, 0  ;;  %p1272_p4 = scmp.lt.s32.totalorder %s1540_s23, 2 }
   0xd   : > { %s2039_s24 = smov (%p33_p0, %s32_s24), 0  ;;  %s223_s27 = sand.u32 1, %s1540_s23  }
   0xe   : > { %2016 = sst [smem:[#allocation16_spill]] %s2039_s24  ;;  %p77_p3 = por %p76_p2, %p75_p1 }
   0xf   : > { %s65_s26 = ssub.s32 %s1536_s22, %s2039_s24  ;;  %s1627_s28 = sand.u32 1, %s1528_s20  }
  0x10   : > { %p66_p5 = scmp.eq.s32.totalorder %s65_s26, 0  ;;  %s1030_s29 = sshll.u32 %s1536_s22, 9 }
  0x11   : > { %s2006_s6 = sshll.u32 %s1627_s28, 9  ;;  %s2018_s1 = sld [smem:[#allocation18_spill]] }
  0x12   : > { %s1631_s30 = scalar_select %p66_p5, %s1528_s20, %s68_s25  }
  0x13   : > { %p1639_p6 = pnand %p1272_p4, %p77_p3  ;;  %s227_s11 = scalar_lea.vmem [#allocation6], %s2006_s6 }
  0x14   : > { %2017 = sst [smem:[#allocation17_spill]] %s1631_s30  ;;  %s234_s12 = sshll.u32 %s227_s11, 4  ;;  %s1645_s12 = int_to_ptr.vmem [resolvable:$true] %s234_s12 }
  0x15   : > { %s2019_s10 = scalar_select %p1639_p6, 1, 0 }
  0x16   : > { %s1647_s13 = scalar_lea.sflag [#allocation7], %s223_s27  ;;  %p1653_p8 = pneg %p1639_p6 }
  0x17   : > { %s1637_s9 = scalar_lea.hbm %s2018_s1, %s1030_s29  ;;  %s1339_s25 = scalar_lea.hbm %s2018_s1, 16384 }
  0x18   : > { %s1334_s14 = scalar_lea.hbm %s1637_s9, 8192  ;;  %p1340_p11 = scmp.lt.u32.totalorder %s1637_s9, %s2018_s1 }
  0x19   : > { %p1335_p7 = scmp.ne.s32.totalorder %s1637_s9, %s1334_s14  ;;  %p1341_p12 = scmp.lt.u32.totalorder %s1339_s25, %s1334_s14 }
  0x1a   : > { %s2020_s15 = scalar_select %p1653_p8, 1, 0 }
  0x1b   : > { %p1337_p9 = pnand %p1653_p8, %p1335_p7  ;;  %p1342_p13 = por %p1341_p12, %p1340_p11 }
  0x1c   : > { %p1343_p0 = scmp.lt.u32.totalorder %s1334_s14, %s1637_s9 }
  0x1d   : > { %p1338_p10 = pneg %p1337_p9 }
  0x1e   : > { %p1344_p1 = por %p1343_p0, %p1342_p13 }
  0x20   : > { %p1345_p2 = pnand %p1344_p1, %p1338_p10 }
  0x22   : > { %1348 = shalt.err (!%p1345_p2)
}
  0x23   : > { %s1349_s27 = scalar_lea.vmem %s1645_s12, 8192  ;;  %s1542_s7 = smov [#allocation6]  }
  0x24   : > { %p1350_p3 = scmp.ne.s32.totalorder %s1645_s12, %s1349_s27  ;;  %s1354_s8 = sshll.u32 %s1542_s7, 4  ;;  %s1355_s8 = int_to_ptr.vmem [resolvable:$false] %s1354_s8 }
  0x25   : > { %s1356_s11 = scalar_lea.vmem %s1355_s8, 16384  ;;  %p1357_p7 = scmp.lt.s32.totalorder %s1645_s12, %s1355_s8 }
  0x26   : > { %p1352_p4 = pnand %p1350_p3, %p1653_p8  ;;  %p1358_p9 = scmp.lt.s32.totalorder %s1356_s11, %s1349_s27 }
  0x28   : > { %p1353_p5 = pneg %p1352_p4  ;;  %p1359_p11 = por %p1358_p9, %p1357_p7 }
  0x2a   : > { %p1360_p12 = pnand %p1359_p11, %p1353_p5 }
  0x2c   : > { %1363 = shalt.err (!%p1360_p12)
}
  0x2d   : > { %s1543_s14 = smov 1024   ;;  %s1544_s16 = smov 512  }
  0x2e   : > { %s1545_s17 = smov 32   ;;  %s1678_s25 = sadd.s32 4294967295, %s1540_s23  }
  0x2f   : > { %1264 = dma.hbm_to_vmem [thread:$0]  (!%p1639_p6), %s1637_s9, 8192, %s1645_s12, %s1647_s13, %s1543_s14, %s1544_s16, %s1545_s17  }
  0x30   : > { %p81_p10 = scmp.ne.s32.totalorder %s1524_s19, %s1520_s18  ;;  %p2008_p13 = scmp.eq.s32.totalorder %s1678_s25, 0 }
  0x31   : > { %p1006_p0 = scmp.ge.s32.totalorder %s1540_s23, 1  ;;  %p191_p1 = scmp.lt.s32.totalorder %s1540_s23, 3 }
  0x32   : > { %p1687_p2 = por %p2008_p13, %p81_p10  ;;  %s1546_s9 = smov [#allocation3]  }
  0x33   : > { %p1691_p3 = pnand %p1006_p0, %p191_p1  ;;  %s206_s12 = sshll.u32 %s1546_s9, 4  ;;  %s1695_s12 = int_to_ptr.vmem [resolvable:$true] %s206_s12 }
  0x34   : > { %s2021_s26 = scalar_select %p1687_p2, 1, 0 }
  0x35   : > { %s2022_s29 = scalar_select %p1691_p3, 1, 0 }
  0x36   : > { %p1257_p4 = pneg %p1691_p3  ;;  %s1012_s18 = sshll.u32 %s1627_s28, 2 }
  0x37   : > { %s1031_s27 = sshll.u32 %s1536_s22, 6  ;;  %s248_s16 = scalar_lea.vmem [#allocation8], %s1012_s18 }
  0x38   : > { %p1703_p5 = pnand %p1257_p4, %p2008_p13  ;;  %s1710_s14 = scalar_lea.hbm %s2002_s2, %s1031_s27 }
  0x39   : > { %s256_s17 = sshll.u32 %s248_s16, 4  ;;  %s1364_s1 = scalar_lea.hbm %s2000_s0, 384  ;;  %s1712_s17 = int_to_ptr.vmem [resolvable:$true] %s256_s17 }
  0x3a   : > { %p1365_p7 = scmp.ne.s32.totalorder %s2000_s0, %s1364_s1  ;;  %p1366_p9 = pneg %p1703_p5 }
  0x3b   : > { %p1371_p10 = scmp.lt.u32.totalorder %s1364_s1, %s2000_s0 }
  0x3c   : > { %p1367_p11 = pnand %p1366_p9, %p1365_p7 }
  0x3e   : > { %p1368_p12 = pneg %p1367_p11 }
  0x40   : > { %p1373_p0 = pnand %p1371_p10, %p1368_p12 }
  0x42   : > { %1376 = shalt.err (!%p1373_p0)
}
  0x43   : > { %s1377_s18 = scalar_lea.vmem %s1695_s12, 384  ;;  %p1385_p2 = scmp.lt.s32.totalorder %s1695_s12, %s1695_s12 }
  0x44   : > { %p1378_p1 = scmp.ne.s32.totalorder %s1695_s12, %s1377_s18  ;;  %p1386_p3 = scmp.lt.s32.totalorder %s1377_s18, %s1377_s18 }
  0x46   : > { %p1380_p4 = pnand %p1378_p1, %p1366_p9  ;;  %p1387_p6 = por %p1386_p3, %p1385_p2 }
  0x48   : > { %p1381_p13 = pneg %p1380_p4 }
  0x4a   : > { %p1388_p8 = pnand %p1387_p6, %p1381_p13 }
  0x4c   : > { %1391 = shalt.err (!%p1388_p8)
}
  0x4d   : > { %s1547_s24 = smov 128   ;;  %s1548_s1 = smov 8  }
  0x4e   : > { %1260 = dma.hbm_to_vmem [thread:$0]  (!%p1703_p5), %s2000_s0, 384, %s1695_s12, [#allocation4], %s1547_s24, %s1547_s24, %s1548_s1  }
  0x4f   : > { %s1392_s27 = scalar_lea.hbm %s1710_s14, 64  ;;  %p2024_p8 = scmp.ne.s32.totalorder %s2020_s15, 0 }
  0x50   : > { %p1393_p6 = scmp.ne.s32.totalorder %s1710_s14, %s1392_s27  ;;  %s1397_s8 = scalar_lea.hbm %s2002_s2, 128 }
  0x51   : > { %p1398_p3 = scmp.lt.u32.totalorder %s1710_s14, %s2002_s2  ;;  %p1399_p7 = scmp.lt.u32.totalorder %s1397_s8, %s1392_s27 }
  0x52   : > { %p1395_p13 = pnand %p1393_p6, %p2024_p8  ;;  %p1401_p11 = scmp.lt.u32.totalorder %s1392_s27, %s1710_s14 }
  0x53   : > { %p1400_p9 = por %p1399_p7, %p1398_p3 }
  0x54   : > { %p1396_p2 = pneg %p1395_p13 }
  0x55   : > { %p1402_p12 = por %p1401_p11, %p1400_p9 }
  0x57   : > { %p1403_p10 = pnand %p1402_p12, %p1396_p2 }
  0x59   : > { %1406 = shalt.err (!%p1403_p10)
}
  0x5a   : > { %s1407_s12 = scalar_lea.vmem %s1712_s17, 64  ;;  %s1549_s7 = smov [#allocation8]  }
  0x5b   : > { %p1408_p5 = scmp.ne.s32.totalorder %s1712_s17, %s1407_s12  ;;  %s1412_s30 = sshll.u32 %s1549_s7, 4  ;;  %s1413_s30 = int_to_ptr.vmem [resolvable:$false] %s1412_s30 }
  0x5c   : > { %s1414_s6 = scalar_lea.vmem %s1413_s30, 128  ;;  %p1415_p4 = scmp.lt.s32.totalorder %s1712_s17, %s1413_s30 }
  0x5d   : > { %p1410_p0 = pnand %p1408_p5, %p2024_p8  ;;  %p1416_p6 = scmp.lt.s32.totalorder %s1414_s6, %s1407_s12 }
  0x5f   : > { %p1411_p1 = pneg %p1410_p0  ;;  %p1417_p13 = por %p1416_p6, %p1415_p4 }
  0x61   : > { %p1418_p3 = pnand %p1417_p13, %p1411_p1 }
  0x63   : > { %1421 = shalt.err (!%p1418_p3)
}
  0x64   : > { %p2025_p2 = scmp.ne.s32.totalorder %s2019_s10, 0  ;;  %s1032_s27 = sshll.u32 %s1536_s22, 13 }
  0x65   : > { %s2026_s16 = sshll.u32 %s1627_s28, 9  ;;  %s1766_s12 = scalar_lea.hbm %s2003_s3, %s1032_s27 }
  0x66   : > { %1267 = dma.hbm_to_vmem [thread:$0]  (!%p2025_p2), %s1710_s14, 64, %s1712_s17, %s1647_s13  }
  0x67   : > { %s267_s9 = scalar_lea.vmem [#allocation9], %s2026_s16  ;;  %s264_s7 = scalar_lea.sflag [#allocation10], %s1627_s28 }
  0x68   : > { %s274_s8 = sshll.u32 %s267_s9, 4  ;;  %s1422_s30 = scalar_lea.hbm %s1766_s12, 8192  ;;  %s1768_s8 = int_to_ptr.vmem [resolvable:$true] %s274_s8 }
  0x69   : > { %p1423_p7 = scmp.ne.s32.totalorder %s1766_s12, %s1422_s30  ;;  %s1427_s17 = scalar_lea.hbm %s2003_s3, 16384 }
  0x6a   : > { %p1428_p12 = scmp.lt.u32.totalorder %s1766_s12, %s2003_s3  ;;  %p1429_p10 = scmp.lt.u32.totalorder %s1427_s17, %s1422_s30 }
  0x6b   : > { %p1425_p9 = pnand %p1423_p7, %p2024_p8  ;;  %p1431_p0 = scmp.lt.u32.totalorder %s1422_s30, %s1766_s12 }
  0x6c   : > { %p1430_p5 = por %p1429_p10, %p1428_p12 }
  0x6d   : > { %p1426_p11 = pneg %p1425_p9 }
  0x6e   : > { %p1432_p1 = por %p1431_p0, %p1430_p5 }
  0x70   : > { %p1433_p4 = pnand %p1432_p1, %p1426_p11 }
  0x72   : > { %1436 = shalt.err (!%p1433_p4)
}
  0x73   : > { %s1437_s27 = scalar_lea.vmem %s1768_s8, 8192  ;;  %s1550_s9 = smov [#allocation9]  }
  0x74   : > { %p1438_p6 = scmp.ne.s32.totalorder %s1768_s8, %s1437_s27  ;;  %s1442_s11 = sshll.u32 %s1550_s9, 4  ;;  %s1443_s11 = int_to_ptr.vmem [resolvable:$false] %s1442_s11 }
  0x75   : > { %s1444_s18 = scalar_lea.vmem %s1443_s11, 16384  ;;  %p1445_p7 = scmp.lt.s32.totalorder %s1768_s8, %s1443_s11 }
  0x76   : > { %p1440_p13 = pnand %p1438_p6, %p2024_p8  ;;  %p1446_p9 = scmp.lt.s32.totalorder %s1444_s18, %s1437_s27 }
  0x78   : > { %p1441_p3 = pneg %p1440_p13  ;;  %p1447_p12 = por %p1446_p9, %p1445_p7 }
  0x7a   : > { %p1448_p10 = pnand %p1447_p12, %p1441_p3 }
  0x7c   : > { %1451 = shalt.err (!%p1448_p10)
}
  0x7d   : > { %1270 = dma.hbm_to_vmem [thread:$0]  (!%p2025_p2), %s1766_s12, 8192, %s1768_s8, %s264_s7, %s1547_s24, %s1547_s24, %s1548_s1  }
  0x7e   : > { %p2027_p8 = scmp.ne.s32.totalorder %s2022_s29, 0 }
  0x7f   : > { %p2028_p11 = scmp.eq.s32.totalorder (!%p2027_p8), %s1678_s25, 0 }
  0x80   : > { %286 = sbr.rel (%p2027_p8) target bundleno = 670 (0x29e), region = 40 }
  0x87   : > { %1503 = dma.done.wait (%p2028_p11), [#allocation4], 384   ;;  %p2029_p5 = pmov %p2028_p11 }
  0x88   : > { %s292_s10 = sand.u32 1, %s1678_s25   ;;  %s294_s15 = sand.u32 1, %s1524_s19  }
  0x89   : > { %1505 = vsyncadd (%p2029_p5), [#allocation4], 4294966912  ;;  %s1020_s30 = sshll.u32 %s294_s15, 9  ;;  %s293_s13 = scalar_lea.sflag [#allocation7], %s292_s10 }
  0x8a   : > { %s1805_s28 = scalar_lea.vmem [#allocation6], %s1020_s30  ;;  %p2030_p0 = scmp.ne.s32.totalorder %s2021_s26, 0 }
  0x8c   : > { %1507 = dma.done.wait (%p2030_p0), %s293_s13, 8256  }
  0x8d   : > { %1509 = vsyncadd (%p2030_p0), %s293_s13, 4294959040  ;;  %s1021_s29 = sshll.u32 %s294_s15, 2  ;;  %s311_s1 = scalar_lea.sflag [#allocation10], %s294_s15 }
  0x8e   : > { %s1811_s24 = scalar_lea.vmem [#allocation8], %s1021_s29  ;;  %s1813_s8 = scalar_lea.vmem [#allocation9], %s1020_s30 }
  0x8f   : > { %1511 = dma.done.wait (%p2030_p0), %s311_s1, 8192  }
  0x90   : > { %1513 = vsyncadd (%p2030_p0), %s311_s1, 4294959104  ;;  %p1023_p2 = scmp.ne.s32.totalorder %s1532_s21, 0 }
  0x91   : > { %v1024_v0 = vld [vmem:[%s2004_s4] ss:$0 sm:$0xff] (!%p1023_p2) }
  0x92   : > { %354 = sbr.rel (%p1023_p2) target bundleno = 153 (0x99), region = 60  ;;  %362 = vst [vmem:[#allocation2] sm:$0xff] (!%p1023_p2), %v1024_v0  ;;  %363 = vst [vmem:[#allocation2 + $0x8] sm:$0xff] (!%p1023_p2), %v1024_v0 }
  0x93   : > { %364 = vst [vmem:[#allocation2 + $0x10] sm:$0xff] (!%p1023_p2), %v1024_v0 }
  0x99 PF: > { %v369_v1 = vld [vmem:[%s1805_s28 + $0x8] sm:$0xff]  ;;  %v371_v3 = vld [vmem:[%s1805_s28 + $0x18] sm:$0xff]  ;;  %v368_v6 = vld [vmem:[%s1805_s28] sm:$0xff]  ;;  %v1551_v8 = vmov 0.0   ;;  %p1025_p1 = scmp.ne.s32.totalorder %s1532_s21, 1 }
  0x9a   : > { %v373_v2 = vld [vmem:[%s1805_s28 + $0x28] sm:$0xff]  ;;  %v375_v5 = vld [vmem:[%s1805_s28 + $0x38] sm:$0xff]  ;;  %v372_v7 = vld [vmem:[%s1805_s28 + $0x20] sm:$0xff]  ;;  %518 = vmatprep.mubr.f32.mxu0 %v1551_v8  ;;  %601 = vmatprep.mubr.f32.mxu1 %v1551_v8 }
  0x9b   : > { %v1115_v4 = vpack.c.bf16 %v373_v2, %v369_v1  ;;  %v1147_v9 = vpack.c.bf16 %v375_v5, %v371_v3  ;;  %v1117_v10 = vpack.c.bf16 %v372_v7, %v368_v6  ;;  %v370_v11 = vld [vmem:[%s1805_s28 + $0x10] sm:$0xff]  ;;  %v377_v13 = vld [vmem:[%s1805_s28 + $0x48] sm:$0xff]  ;;  %v379_v16 = vld [vmem:[%s1805_s28 + $0x58] sm:$0xff] }
  0x9c   : > { %v374_v12 = vld [vmem:[%s1805_s28 + $0x30] sm:$0xff]  ;;  %v381_v15 = vld [vmem:[%s1805_s28 + $0x68] sm:$0xff]  ;;  %v383_v17 = vld [vmem:[%s1805_s28 + $0x78] sm:$0xff] }
  0x9d   : > { %1116 = vmatprep.subr.bf16.mxu0 %v1115_v4  ;;  %v1149_v14 = vpack.c.bf16 %v374_v12, %v370_v11  ;;  %1148 = vmatprep.subr.bf16.mxu1 %v1147_v9  ;;  %v1119_v18 = vpack.c.bf16 %v381_v15, %v377_v13  ;;  %v1151_v19 = vpack.c.bf16 %v383_v17, %v379_v16  ;;  %v376_v20 = vld [vmem:[%s1805_s28 + $0x40] sm:$0xff]  ;;  %v378_v22 = vld [vmem:[%s1805_s28 + $0x50] sm:$0xff]  ;;  %v385_v25 = vld [vmem:[%s1805_s28 + $0x88] sm:$0xff] }
  0x9e   : > { %1118 = vmatpush1.bf16.msra.mxu0 %v1117_v10  ;;  %v380_v21 = vld [vmem:[%s1805_s28 + $0x60] sm:$0xff]  ;;  %v382_v24 = vld [vmem:[%s1805_s28 + $0x70] sm:$0xff]  ;;  %v389_v26 = vld [vmem:[%s1805_s28 + $0xa8] sm:$0xff] }
  0x9f   : > { %1150 = vmatpush1.bf16.msra.mxu1 %v1149_v14  ;;  %v1121_v23 = vpack.c.bf16 %v380_v21, %v376_v20  ;;  %1120 = vmatprep.subr.bf16.mxu0 %v1119_v18  ;;  %v1153_v27 = vpack.c.bf16 %v382_v24, %v378_v22  ;;  %v1123_v28 = vpack.c.bf16 %v389_v26, %v385_v25  ;;  %v387_v29 = vld [vmem:[%s1805_s28 + $0x98] sm:$0xff]  ;;  %v384_v31 = vld [vmem:[%s1805_s28 + $0x80] sm:$0xff]  ;;  %v386_v34 = vld [vmem:[%s1805_s28 + $0x90] sm:$0xff] }
  0xa0   : > { %1152 = vmatprep.subr.bf16.mxu1 %v1151_v19  ;;  %v391_v30 = vld [vmem:[%s1805_s28 + $0xb8] sm:$0xff]  ;;  %v388_v33 = vld [vmem:[%s1805_s28 + $0xa0] sm:$0xff]  ;;  %v390_v35 = vld [vmem:[%s1805_s28 + $0xb0] sm:$0xff] }
  0xa1   : > { %v1155_v32 = vpack.c.bf16 %v391_v30, %v387_v29  ;;  %v1125_v36 = vpack.c.bf16 %v388_v33, %v384_v31  ;;  %v393_v37 = vld [vmem:[%s1805_s28 + $0xc8] sm:$0xff]  ;;  %v395_v39 = vld [vmem:[%s1805_s28 + $0xd8] sm:$0xff]  ;;  %v1157_v40 = vpack.c.bf16 %v390_v35, %v386_v34  ;;  %v392_v43 = vld [vmem:[%s1805_s28 + $0xc0] sm:$0xff] }
  0xa2   : > { %1122 = vmatpush1.bf16.msra.mxu0 %v1121_v23  ;;  %v397_v38 = vld [vmem:[%s1805_s28 + $0xe8] sm:$0xff]  ;;  %v399_v42 = vld [vmem:[%s1805_s28 + $0xf8] sm:$0xff]  ;;  %v396_v44 = vld [vmem:[%s1805_s28 + $0xe0] sm:$0xff] }
  0xa3   : > { %1154 = vmatpush1.bf16.msra.mxu1 %v1153_v27  ;;  %1124 = vmatprep.subr.bf16.mxu0 %v1123_v28  ;;  %v1127_v41 = vpack.c.bf16 %v397_v38, %v393_v37  ;;  %v1159_v45 = vpack.c.bf16 %v399_v42, %v395_v39  ;;  %v394_v46 = vld [vmem:[%s1805_s28 + $0xd0] sm:$0xff]  ;;  %v401_v48 = vld [vmem:[%s1805_s28 + $0x108] sm:$0xff]  ;;  %v403_v50 = vld [vmem:[%s1805_s28 + $0x118] sm:$0xff]  ;;  %v1129_v52 = vpack.c.bf16 %v396_v44, %v392_v43 }
  0xa4   : > { %1156 = vmatprep.subr.bf16.mxu1 %v1155_v32  ;;  %v398_v47 = vld [vmem:[%s1805_s28 + $0xf0] sm:$0xff]  ;;  %v405_v49 = vld [vmem:[%s1805_s28 + $0x128] sm:$0xff]  ;;  %v407_v51 = vld [vmem:[%s1805_s28 + $0x138] sm:$0xff] }
  0xa5   : > { %v1161_v53 = vpack.c.bf16 %v398_v47, %v394_v46  ;;  %v1131_v54 = vpack.c.bf16 %v405_v49, %v401_v48  ;;  %v400_v55 = vld [vmem:[%s1805_s28 + $0x100] sm:$0xff]  ;;  %v402_v57 = vld [vmem:[%s1805_s28 + $0x110] sm:$0xff]  ;;  %v1163_v58 = vpack.c.bf16 %v407_v51, %v403_v50  ;;  %v409_v60 = vld [vmem:[%s1805_s28 + $0x148] sm:$0xff] }
  0xa6   : > { %1126 = vmatpush1.bf16.msra.mxu0 %v1125_v36  ;;  %v404_v56 = vld [vmem:[%s1805_s28 + $0x120] sm:$0xff]  ;;  %v406_v59 = vld [vmem:[%s1805_s28 + $0x130] sm:$0xff]  ;;  %v413_v61 = vld [vmem:[%s1805_s28 + $0x168] sm:$0xff] }
  0xa7   : > { %1158 = vmatpush1.bf16.msra.mxu1 %v1157_v40  ;;  %1128 = vmatprep.subr.bf16.mxu0 %v1127_v41  ;;  %v411_v62 = vld [vmem:[%s1805_s28 + $0x158] sm:$0xff]  ;;  %v1133_v0 = vpack.c.bf16 %v404_v56, %v400_v55  ;;  %v1165_v1 = vpack.c.bf16 %v406_v59, %v402_v57  ;;  %v1135_v2 = vpack.c.bf16 %v413_v61, %v409_v60  ;;  %v408_v3 = vld [vmem:[%s1805_s28 + $0x140] sm:$0xff]  ;;  %v410_v5 = vld [vmem:[%s1805_s28 + $0x150] sm:$0xff] }
  0xa8   : > { %1160 = vmatprep.subr.bf16.mxu1 %v1159_v45  ;;  %v415_v63 = vld [vmem:[%s1805_s28 + $0x178] sm:$0xff]  ;;  %v412_v4 = vld [vmem:[%s1805_s28 + $0x160] sm:$0xff]  ;;  %v414_v7 = vld [vmem:[%s1805_s28 + $0x170] sm:$0xff] }
  0xa9   : > { %v1167_v6 = vpack.c.bf16 %v415_v63, %v411_v62  ;;  %v417_v9 = vld [vmem:[%s1805_s28 + $0x188] sm:$0xff]  ;;  %v419_v11 = vld [vmem:[%s1805_s28 + $0x198] sm:$0xff]  ;;  %v1137_v13 = vpack.c.bf16 %v412_v4, %v408_v3  ;;  %v1169_v14 = vpack.c.bf16 %v414_v7, %v410_v5  ;;  %v416_v16 = vld [vmem:[%s1805_s28 + $0x180] sm:$0xff] }
  0xaa   : > { %1130 = vmatpush1.bf16.msra.mxu0 %v1129_v52  ;;  %v421_v10 = vld [vmem:[%s1805_s28 + $0x1a8] sm:$0xff]  ;;  %v423_v12 = vld [vmem:[%s1805_s28 + $0x1b8] sm:$0xff]  ;;  %v420_v17 = vld [vmem:[%s1805_s28 + $0x1a0] sm:$0xff] }
  0xab   : > { %1162 = vmatpush1.bf16.msra.mxu1 %v1161_v53  ;;  %1132 = vmatprep.subr.bf16.mxu0 %v1131_v54  ;;  %v1139_v15 = vpack.c.bf16 %v421_v10, %v417_v9  ;;  %v418_v18 = vld [vmem:[%s1805_s28 + $0x190] sm:$0xff]  ;;  %v1171_v19 = vpack.c.bf16 %v423_v12, %v419_v11  ;;  %v425_v21 = vld [vmem:[%s1805_s28 + $0x1c8] sm:$0xff]  ;;  %v427_v23 = vld [vmem:[%s1805_s28 + $0x1d8] sm:$0xff]  ;;  %v1141_v25 = vpack.c.bf16 %v420_v17, %v416_v16 }
  0xac   : > { %1164 = vmatprep.subr.bf16.mxu1 %v1163_v58  ;;  %v422_v20 = vld [vmem:[%s1805_s28 + $0x1b0] sm:$0xff]  ;;  %v429_v22 = vld [vmem:[%s1805_s28 + $0x1e8] sm:$0xff]  ;;  %v431_v24 = vld [vmem:[%s1805_s28 + $0x1f8] sm:$0xff] }
  0xad   : > { %v1173_v26 = vpack.c.bf16 %v422_v20, %v418_v18  ;;  %v1143_v27 = vpack.c.bf16 %v429_v22, %v425_v21  ;;  %v424_v28 = vld [vmem:[%s1805_s28 + $0x1c0] sm:$0xff]  ;;  %v426_v30 = vld [vmem:[%s1805_s28 + $0x1d0] sm:$0xff]  ;;  %v1175_v31 = vpack.c.bf16 %v431_v24, %v427_v23  ;;  %v651_v33 = vld [vmem:[%s1813_s8 + $0x80] sm:$0xff] }
  0xae   : > { %1134 = vmatpush1.bf16.msra.mxu0 %v1133_v0  ;;  %v428_v29 = vld [vmem:[%s1805_s28 + $0x1e0] sm:$0xff]  ;;  %v430_v32 = vld [vmem:[%s1805_s28 + $0x1f0] sm:$0xff]  ;;  %v683_v35 = vld [vmem:[%s1813_s8 + $0x180] sm:$0xff] }
  0xaf   : > { %1166 = vmatpush1.bf16.msra.mxu1 %v1165_v1  ;;  %1136 = vmatprep.subr.bf16.mxu0 %v1135_v2  ;;  %v652_v34 = vld [vmem:[%s1813_s8 + $0x88] sm:$0xff]  ;;  %v1145_v37 = vpack.c.bf16 %v428_v29, %v424_v28  ;;  %v1177_v38 = vpack.c.bf16 %v430_v32, %v426_v30  ;;  %v635_v41 = vld [vmem:[%s1813_s8] sm:$0xff]  ;;  %v653_v45 = vld [vmem:[%s1813_s8 + $0x90] sm:$0xff] }
  0xb0   : > { %1168 = vmatprep.subr.bf16.mxu1 %v1167_v6  ;;  %v684_v36 = vld [vmem:[%s1813_s8 + $0x188] sm:$0xff]  ;;  %v1179_v39 = vpack.c.bf16 %v652_v34, %v651_v33  ;;  %v667_v43 = vld [vmem:[%s1813_s8 + $0x100] sm:$0xff]  ;;  %v654_v46 = vld [vmem:[%s1813_s8 + $0x98] sm:$0xff] }
  0xb1   : > { %v1211_v40 = vpack.c.bf16 %v684_v36, %v683_v35  ;;  %v636_v42 = vld [vmem:[%s1813_s8 + $0x8] sm:$0xff]  ;;  %v365_v47 = vld [vmem:[#allocation3] sm:$0xff]  ;;  %v685_v48 = vld [vmem:[%s1813_s8 + $0x190] sm:$0xff]  ;;  %v1183_v52 = vpack.c.bf16 %v654_v46, %v653_v45 }
  0xb2   : > { %1138 = vmatpush1.bf16.msra.mxu0 %v1137_v13  ;;  %v668_v44 = vld [vmem:[%s1813_s8 + $0x108] sm:$0xff]  ;;  %v686_v49 = vld [vmem:[%s1813_s8 + $0x198] sm:$0xff]  ;;  %v1181_v50 = vpack.c.bf16 %v636_v42, %v635_v41  ;;  %v637_v53 = vld [vmem:[%s1813_s8 + $0x10] sm:$0xff] }
  0xb3   : > { %1170 = vmatpush1.bf16.msra.mxu1 %v1169_v14  ;;  %1140 = vmatprep.subr.bf16.mxu0 %v1139_v15  ;;  %v1213_v51 = vpack.c.bf16 %v668_v44, %v667_v43  ;;  %v638_v54 = vld [vmem:[%s1813_s8 + $0x18] sm:$0xff]  ;;  %v669_v55 = vld [vmem:[%s1813_s8 + $0x110] sm:$0xff]  ;;  %v1215_v56 = vpack.c.bf16 %v686_v49, %v685_v48  ;;  %v655_v58 = vld [vmem:[%s1813_s8 + $0xa0] sm:$0xff] }
  0xb4   : > { %1172 = vmatprep.subr.bf16.mxu1 %v1171_v19  ;;  %v670_v57 = vld [vmem:[%s1813_s8 + $0x118] sm:$0xff]  ;;  %v656_v59 = vld [vmem:[%s1813_s8 + $0xa8] sm:$0xff]  ;;  %v687_v61 = vld [vmem:[%s1813_s8 + $0x1a0] sm:$0xff]  ;;  %v1185_v63 = vpack.c.bf16 %v638_v54, %v637_v53 }
  0xb5   : > { %v366_v60 = vld [vmem:[#allocation3 + $0x8] sm:$0xff]  ;;  %v1217_v0 = vpack.c.bf16 %v670_v57, %v669_v55  ;;  %v1187_v1 = vpack.c.bf16 %v656_v59, %v655_v58  ;;  %v639_v2 = vld [vmem:[%s1813_s8 + $0x20] sm:$0xff]  ;;  %v657_v7 = vld [vmem:[%s1813_s8 + $0xb0] sm:$0xff] }
  0xb6   : > { %1142 = vmatpush1.bf16.msra.mxu0 %v1141_v25  ;;  %v688_v62 = vld [vmem:[%s1813_s8 + $0x1a8] sm:$0xff]  ;;  %v671_v4 = vld [vmem:[%s1813_s8 + $0x120] sm:$0xff]  ;;  %v658_v9 = vld [vmem:[%s1813_s8 + $0xb8] sm:$0xff] }
  0xb7   : > { %1174 = vmatpush1.bf16.msra.mxu1 %v1173_v26  ;;  %1144 = vmatprep.subr.bf16.mxu0 %v1143_v27  ;;  %v640_v3 = vld [vmem:[%s1813_s8 + $0x28] sm:$0xff]  ;;  %v1219_v5 = vpack.c.bf16 %v688_v62, %v687_v61  ;;  %v367_v10 = vld [vmem:[#allocation3 + $0x10] sm:$0xff]  ;;  %v690_v12 = vld [vmem:[%s1813_s8 + $0x1b8] sm:$0xff]  ;;  %v1191_v15 = vpack.c.bf16 %v658_v9, %v657_v7 }
  0xb8   : > { %1176 = vmatprep.subr.bf16.mxu1 %v1175_v31  ;;  %v672_v6 = vld [vmem:[%s1813_s8 + $0x128] sm:$0xff]  ;;  %v689_v11 = vld [vmem:[%s1813_s8 + $0x1b0] sm:$0xff]  ;;  %v1189_v13 = vpack.c.bf16 %v640_v3, %v639_v2  ;;  %v642_v17 = vld [vmem:[%s1813_s8 + $0x38] sm:$0xff] }
  0xb9   : > { %v1221_v14 = vpack.c.bf16 %v672_v6, %v671_v4  ;;  %v641_v16 = vld [vmem:[%s1813_s8 + $0x30] sm:$0xff]  ;;  %v1223_v19 = vpack.c.bf16 %v690_v12, %v689_v11  ;;  %v674_v20 = vld [vmem:[%s1813_s8 + $0x138] sm:$0xff]  ;;  %v659_v21 = vld [vmem:[%s1813_s8 + $0xc0] sm:$0xff]  ;;  %v434_v6 = vlaneseq }
  0xba   : > { %1146 = vmatpush1.bf16.msra.mxu0 %v1145_v37  ;;  %v673_v18 = vld [vmem:[%s1813_s8 + $0x130] sm:$0xff]  ;;  %v691_v22 = vld [vmem:[%s1813_s8 + $0x1c0] sm:$0xff]  ;;  %v692_v23 = vld [vmem:[%s1813_s8 + $0x1c8] sm:$0xff]  ;;  %v1193_v24 = vpack.c.bf16 %v642_v17, %v641_v16 }
  0xbb   : > { %1178 = vmatpush1.bf16.msra.mxu1 %v1177_v38  ;;  %1180 = vmatprep.subr.bf16.mxu0 %v1179_v39  ;;  %v1225_v25 = vpack.c.bf16 %v674_v20, %v673_v18  ;;  %v643_v27 = vld [vmem:[%s1813_s8 + $0x40] sm:$0xff]  ;;  %v644_v28 = vld [vmem:[%s1813_s8 + $0x48] sm:$0xff]  ;;  %v1227_v30 = vpack.c.bf16 %v692_v23, %v691_v22  ;;  %v661_v32 = vld [vmem:[%s1813_s8 + $0xd0] sm:$0xff]  ;;  %v435_v7 = vshrl.u32 %v434_v6, 7 }
  0xbc   : > { %1212 = vmatprep.subr.bf16.mxu1 %v1211_v40  ;;  %v675_v29 = vld [vmem:[%s1813_s8 + $0x140] sm:$0xff]  ;;  %v676_v31 = vld [vmem:[%s1813_s8 + $0x148] sm:$0xff]  ;;  %v662_v33 = vld [vmem:[%s1813_s8 + $0xd8] sm:$0xff]  ;;  %v1197_v36 = vpack.c.bf16 %v644_v28, %v643_v27 }
  0xbd   : > { %519 = vmatmul.mubr.f32.vlgmr.msra.gmra.mrb[0].mxu0 %v365_v47  ;;  %v693_v34 = vld [vmem:[%s1813_s8 + $0x1d0] sm:$0xff]  ;;  %v694_v35 = vld [vmem:[%s1813_s8 + $0x1d8] sm:$0xff]  ;;  %v1229_v37 = vpack.c.bf16 %v676_v31, %v675_v29  ;;  %v1199_v38 = vpack.c.bf16 %v662_v33, %v661_v32  ;;  %v663_v44 = vld [vmem:[%s1813_s8 + $0xe0] sm:$0xff]  ;;  %v436_v9 = vsub.s32 0, %v435_v7  ;;  %v444_v11 = vsub.s32 2, %v435_v7 }
  0xbe   : > { %602 = vmatmul.mubr.f32.vlgmr.msra.gmra.mrb[0].mxu1 %v365_v47  ;;  %524 = vmatprep.mubr.f32.mxu0 %v1551_v8  ;;  %v645_v39 = vld [vmem:[%s1813_s8 + $0x50] sm:$0xff]  ;;  %v646_v40 = vld [vmem:[%s1813_s8 + $0x58] sm:$0xff]  ;;  %v1231_v42 = vpack.c.bf16 %v694_v35, %v693_v34  ;;  %v664_v45 = vld [vmem:[%s1813_s8 + $0xe8] sm:$0xff]  ;;  %v440_v12 = vsub.s32 1, %v435_v7 }
  0xbf   : > { %607 = vmatprep.mubr.f32.mxu1 %v1551_v8  ;;  %1182 = vmatpush3.bf16.msra.mxu0 %v1181_v50  ;;  %v677_v41 = vld [vmem:[%s1813_s8 + $0x150] sm:$0xff]  ;;  %v678_v43 = vld [vmem:[%s1813_s8 + $0x158] sm:$0xff]  ;;  %v695_v46 = vld [vmem:[%s1813_s8 + $0x1e0] sm:$0xff]  ;;  %v1201_v48 = vpack.c.bf16 %v646_v40, %v645_v39  ;;  %v1203_v50 = vpack.c.bf16 %v664_v45, %v663_v44 }
  0xc0   : > { %1214 = vmatpush3.bf16.msra.mxu1 %v1213_v51  ;;  %1184 = vmatprep.subr.bf16.mxu0 %v1183_v52  ;;  %v696_v47 = vld [vmem:[%s1813_s8 + $0x1e8] sm:$0xff]  ;;  %v1233_v49 = vpack.c.bf16 %v678_v43, %v677_v41  ;;  %v647_v52 = vld [vmem:[%s1813_s8 + $0x60] sm:$0xff]  ;;  %v665_v58 = vld [vmem:[%s1813_s8 + $0xf0] sm:$0xff] }
  0xc1   : > { %525 = vmatmul.mubr.f32.gmra.mrb[2].mxu0 %v366_v60  ;;  %1216 = vmatprep.subr.bf16.mxu1 %v1215_v56  ;;  %v1235_v51 = vpack.c.bf16 %v696_v47, %v695_v46  ;;  %v648_v53 = vld [vmem:[%s1813_s8 + $0x68] sm:$0xff]  ;;  %v679_v54 = vld [vmem:[%s1813_s8 + $0x160] sm:$0xff]  ;;  %v666_v59 = vld [vmem:[%s1813_s8 + $0xf8] sm:$0xff] }
  0xc2   : > { %608 = vmatmul.mubr.f32.gmra.mrb[2].mxu1 %v366_v60  ;;  %530 = vmatprep.mubr.f32.mxu0 %v1551_v8  ;;  %v1205_v55 = vpack.c.bf16 %v648_v53, %v647_v52  ;;  %v680_v56 = vld [vmem:[%s1813_s8 + $0x168] sm:$0xff]  ;;  %v697_v60 = vld [vmem:[%s1813_s8 + $0x1f0] sm:$0xff]  ;;  %v1207_v61 = vpack.c.bf16 %v666_v59, %v665_v58  ;;  %v698_v62 = vld [vmem:[%s1813_s8 + $0x1f8] sm:$0xff] }
  0xc3   : > { %613 = vmatprep.mubr.f32.mxu1 %v1551_v8  ;;  %1186 = vmatpush3.bf16.msra.mxu0 %v1185_v63  ;;  %v660_v8 = vld [vmem:[%s1813_s8 + $0xc8] sm:$0xff]  ;;  %v1237_v57 = vpack.c.bf16 %v680_v56, %v679_v54  ;;  %v649_v63 = vld [vmem:[%s1813_s8 + $0x70] sm:$0xff]  ;;  %v682_v4 = vld [vmem:[%s1813_s8 + $0x178] sm:$0xff] }
  0xc4   : > { %1218 = vmatpush3.bf16.msra.mxu1 %v1217_v0  ;;  %1188 = vmatprep.subr.bf16.mxu0 %v1187_v1  ;;  %v1195_v26 = vpack.c.bf16 %v660_v8, %v659_v21  ;;  %v650_v0 = vld [vmem:[%s1813_s8 + $0x78] sm:$0xff]  ;;  %v1239_v1 = vpack.c.bf16 %v698_v62, %v697_v60  ;;  %v681_v3 = vld [vmem:[%s1813_s8 + $0x170] sm:$0xff]  ;;  %v632_v59 = vld [vmem:[#allocation2] sm:$0xff] }
  0xc5   : > { %531 = vmatmul.mubr.f32.gmra.mrb[4].mxu0 %v367_v10  ;;  %1220 = vmatprep.subr.bf16.mxu1 %v1219_v5  ;;  %v1209_v2 = vpack.c.bf16 %v650_v0, %v649_v63  ;;  %v1241_v5 = vpack.c.bf16 %v682_v4, %v681_v3  ;;  %v633_v4 = vld [vmem:[#allocation2 + $0x8] sm:$0xff] }
  0xc6   : > { %614 = vmatmul.mubr.f32.gmra.mrb[4].mxu1 %v367_v10  ;;  %v432_v10 = vld [vmem:[%s1811_s24] sm:$0xf] }
  0xc7   : > { %1190 = vmatpush3.bf16.msra.mxu0 %v1189_v13  ;;  %v448_v13 = vsub.s32 3, %v435_v7  ;;  %v441_v16 = vrot.slane %v432_v10, %v440_v12 }
  0xc8   : > { %1222 = vmatpush3.bf16.msra.mxu1 %v1221_v14  ;;  %1192 = vmatprep.subr.bf16.mxu0 %v1191_v15  ;;  %v437_v14 = vrot.slane %v432_v10, %v436_v9  ;;  %v445_v15 = vrot.slane %v432_v10, %v444_v11 }
  0xc9   : > { %1224 = vmatprep.subr.bf16.mxu1 %v1223_v19  ;;  %v449_v17 = vrot.slane %v432_v10, %v448_v13 }
  0xcb   : > { %1194 = vmatpush3.bf16.msra.mxu0 %v1193_v24 }
  0xcc   : > { %1226 = vmatpush3.bf16.msra.mxu1 %v1225_v25  ;;  %1196 = vmatprep.subr.bf16.mxu0 %v1195_v26 }
  0xcd   : > { %1228 = vmatprep.subr.bf16.mxu1 %v1227_v30 }
  0xcf   : > { %1198 = vmatpush3.bf16.msra.mxu0 %v1197_v36 }
  0xd0   : > { %1230 = vmatpush3.bf16.msra.mxu1 %v1229_v37  ;;  %1200 = vmatprep.subr.bf16.mxu0 %v1199_v38 }
  0xd1   : > { %1232 = vmatprep.subr.bf16.mxu1 %v1231_v42 }
  0xd3   : > { %1202 = vmatpush3.bf16.msra.mxu0 %v1201_v48 }
  0xd4   : > { %1234 = vmatpush3.bf16.msra.mxu1 %v1233_v49  ;;  %1204 = vmatprep.subr.bf16.mxu0 %v1203_v50 }
  0xd5   : > { %1236 = vmatprep.subr.bf16.mxu1 %v1235_v51 }
  0xd7   : > { %1206 = vmatpush3.bf16.msra.mxu0 %v1205_v55 }
  0xd8   : > { %1238 = vmatpush3.bf16.msra.mxu1 %v1237_v57  ;;  %1208 = vmatprep.subr.bf16.mxu0 %v1207_v61 }
  0xd9   : > { %1240 = vmatprep.subr.bf16.mxu1 %v1239_v1 }
  0xdb   : > { %1210 = vmatpush3.bf16.msra.mxu0 %v1209_v2 }
  0xdc   : > { %1242 = vmatpush3.bf16.msra.mxu1 %v1241_v5 }
 0x190   : > { %v520_v18 = vpop.f32.mrb[0].mxu0 }
 0x191   : > { %v521_v19 = vadd.f32 %v520_v18, %v437_v14  ;;  %v603_v20 = vpop.f32.mrb[0].mxu1  ;;  %v522_v21 = vpop.f32.mrb[1].mxu0 }
 0x192   : > { %v604_v8 = vadd.f32 %v603_v20, %v445_v15  ;;  %v523_v22 = vadd.f32 %v522_v21, %v441_v16  ;;  %v605_v23 = vpop.f32.mrb[1].mxu1 }
 0x193   : > { %v606_v24 = vadd.f32 %v605_v23, %v449_v17  ;;  %v620_v27 = vmax.f32 %v521_v19, 0.0 }
 0x194   : > { %v621_v25 = vmax.f32 %v523_v22, 0.0  ;;  %v526_v26 = vpop.f32.mrb[2].mxu0  ;;  %v622_v32 = vmax.f32 %v604_v8, 0.0 }
 0x195   : > { %v623_v28 = vmax.f32 %v606_v24, 0.0  ;;  %v527_v29 = vadd.f32 %v526_v26, %v437_v14  ;;  %v609_v30 = vpop.f32.mrb[2].mxu1  ;;  %v528_v31 = vpop.f32.mrb[3].mxu0 }
 0x196   : > { %v610_v33 = vadd.f32 %v609_v30, %v445_v15  ;;  %v529_v34 = vadd.f32 %v528_v31, %v441_v16  ;;  %v611_v35 = vpop.f32.mrb[3].mxu1  ;;  %763 = vmatprep.mubr.f32.mxu0 %v621_v25 }
 0x197   : > { %v612_v36 = vadd.f32 %v611_v35, %v449_v17  ;;  %843 = vmatprep.mubr.f32.mxu1 %v623_v28  ;;  %764 = vmatmul.mubr.f32.vlgmr.msra.gmra.mrb[6].mxu0 %v620_v27  ;;  %v624_v39 = vmax.f32 %v527_v29, 0.0 }
 0x198   : > { %v625_v37 = vmax.f32 %v529_v34, 0.0  ;;  %844 = vmatmul.mubr.f32.vlgmr.msra.gmra.mrb[6].mxu1 %v622_v32  ;;  %v532_v38 = vpop.f32.mrb[4].mxu0  ;;  %v626_v44 = vmax.f32 %v610_v33, 0.0 }
 0x199   : > { %v627_v40 = vmax.f32 %v612_v36, 0.0  ;;  %v533_v41 = vadd.f32 %v532_v38, %v437_v14  ;;  %v615_v42 = vpop.f32.mrb[4].mxu1  ;;  %v534_v43 = vpop.f32.mrb[5].mxu0  ;;  %v634_v14 = vld [vmem:[#allocation2 + $0x10] sm:$0xff] }
 0x19a   : > { %v616_v45 = vadd.f32 %v615_v42, %v445_v15  ;;  %v535_v46 = vadd.f32 %v534_v43, %v441_v16  ;;  %v617_v47 = vpop.f32.mrb[5].mxu1  ;;  %768 = vmatprep.mubr.f32.mxu0 %v625_v37 }
 0x19b   : > { %v618_v48 = vadd.f32 %v617_v47, %v449_v17  ;;  %848 = vmatprep.mubr.f32.mxu1 %v627_v40  ;;  %769 = vmatmul.mubr.f32.gmra.mrb[8].mxu0 %v624_v39  ;;  %v628_v50 = vmax.f32 %v533_v41, 0.0 }
 0x19c   : > { %v629_v49 = vmax.f32 %v535_v46, 0.0  ;;  %849 = vmatmul.mubr.f32.gmra.mrb[8].mxu1 %v626_v44  ;;  %v630_v52 = vmax.f32 %v616_v45, 0.0 }
 0x19d   : > { %v631_v51 = vmax.f32 %v618_v48, 0.0 }
 0x19e   : > { %773 = vmatprep.mubr.f32.mxu0 %v629_v49 }
 0x19f   : > { %853 = vmatprep.mubr.f32.mxu1 %v631_v51  ;;  %774 = vmatmul.mubr.f32.gmra.mrb[10].mxu0 %v628_v50 }
 0x1a0   : > { %854 = vmatmul.mubr.f32.gmra.mrb[10].mxu1 %v630_v52 }
 0x26a   : > { %v1065_v53 = vpop.f32.mrb[6].mxu0 }
 0x26b   : > { %v1106_v54 = vpop.f32.mrb[6].mxu1  ;;  %v1066_v55 = vpop.f32.mrb[7].mxu0 }
 0x26c   : > { %v1067_v56 = vadd.f32 %v1066_v55, %v1065_v53  ;;  %v1107_v57 = vpop.f32.mrb[7].mxu1 }
 0x26d   : > { %v1108_v58 = vadd.f32 %v1107_v57, %v1106_v54 }
 0x26e   : > { %v1068_v60 = vpop.f32.mrb[8].mxu0 }
 0x26f   : > { %v846_v61 = vadd.f32 %v1108_v58, %v1067_v56  ;;  %v1109_v62 = vpop.f32.mrb[8].mxu1  ;;  %v1069_v63 = vpop.f32.mrb[9].mxu0 }
 0x270   : > { %v1070_v0 = vadd.f32 %v1069_v63, %v1068_v60  ;;  %v1110_v1 = vpop.f32.mrb[9].mxu1 }
 0x271   : > { %v859_v2 = vadd.f32 %v846_v61, %v632_v59  ;;  %v1111_v3 = vadd.f32 %v1110_v1, %v1109_v62 }
 0x272   : > { %v1071_v5 = vpop.f32.mrb[10].mxu0 }
 0x273   : > { %862 = vst [vmem:[#allocation2] sm:$0xff] %v859_v2  ;;  %v851_v6 = vadd.f32 %v1111_v3, %v1070_v0  ;;  %v1112_v7 = vpop.f32.mrb[10].mxu1  ;;  %v1072_v9 = vpop.f32.mrb[11].mxu0 }
 0x274   : > { %v1073_v10 = vadd.f32 %v1072_v9, %v1071_v5  ;;  %v1113_v11 = vpop.f32.mrb[11].mxu1 }
 0x275   : > { %v860_v12 = vadd.f32 %v851_v6, %v633_v4  ;;  %v1114_v13 = vadd.f32 %v1113_v11, %v1112_v7  ;;  %868 = sbr.rel (%p1025_p1) target bundleno = 644 (0x284), region = 64 }
 0x277   : > { %863 = vst [vmem:[#allocation2 + $0x8] sm:$0xff] %v860_v12  ;;  %v856_v15 = vadd.f32 %v1114_v13, %v1073_v10 }
 0x279   : > { %v861_v16 = vadd.f32 %v856_v15, %v634_v14 }
 0x27a   : > { %v869_v17 = vld [vmem:[#allocation2] sm:$0xff] (!%p1025_p1) }
 0x27b   : > { %864 = vst [vmem:[#allocation2 + $0x10] sm:$0xff] %v861_v16  ;;  %872 = vst [vmem:[#allocation11] sm:$0xff] (!%p1025_p1), %v869_v17 }
 0x27e   : > { %v870_v18 = vld [vmem:[#allocation2 + $0x8] sm:$0xff] }
 0x27f   : > { %873 = vst [vmem:[#allocation11 + $0x8] sm:$0xff] %v870_v18 }
 0x282   : > { %v871_v19 = vld [vmem:[#allocation2 + $0x10] sm:$0xff] }
 0x283   : > { %874 = vst [vmem:[#allocation11 + $0x10] sm:$0xff] %v871_v19 }
 0x284 PF: > { %p1274_p4 = scmp.eq.s32.totalorder %s1678_s25, 1  ;;  %s1552_s26 = smov [#allocation11]  }
 0x285   : > { %s884_s14 = sshll.u32 %s1552_s26, 4  ;;  %s885_s14 = int_to_ptr.vmem [resolvable:$true] %s884_s14 }
 0x286   : > { %s1452_s17 = scalar_lea.vmem %s885_s14, 384  ;;  %p1459_p7 = scmp.lt.s32.totalorder %s885_s14, %s885_s14 }
 0x287   : > { %p1453_p6 = scmp.ne.s32.totalorder %s885_s14, %s1452_s17  ;;  %p1460_p9 = scmp.lt.s32.totalorder %s1452_s17, %s1452_s17 }
 0x289   : > { %p1454_p13 = pnand %p1453_p6, %p1274_p4  ;;  %p1461_p12 = por %p1460_p9, %p1459_p7 }
 0x28b   : > { %p1455_p3 = pneg %p1454_p13 }
 0x28d   : > { %p1462_p10 = pnand %p1461_p12, %p1455_p3 }
 0x28f   : > { %1465 = shalt.err (!%p1462_p10)
}
 0x290   : > { %s1466_s16 = scalar_lea.hbm %s2005_s5, 384 }
 0x291   : > { %p1467_p8 = scmp.ne.s32.totalorder %s2005_s5, %s1466_s16  ;;  %p1472_p0 = scmp.lt.u32.totalorder %s1466_s16, %s2005_s5 }
 0x293   : > { %p1468_p11 = pnand %p1467_p8, %p1274_p4 }
 0x295   : > { %p1469_p5 = pneg %p1468_p11 }
 0x297   : > { %p1474_p2 = pnand %p1472_p0, %p1469_p5 }
 0x299   : > { %1477 = shalt.err (!%p1474_p2)
}
 0x29a   : > { %s1553_s10 = smov 128   ;;  %s1554_s15 = smov 8  }
 0x29b   : > { %1254 = dma.vmem_to_hbm [thread:$0]  (%p1274_p4), %s885_s14, 384, %s2005_s5, [#allocation5], %s1553_s10, %s1553_s10, %s1554_s15  }
 0x29c   : > { %1515 = dma.done.wait (%p1274_p4), [#allocation5], 384  }
 0x29d   : > { %1517 = vsyncadd (%p1274_p4), [#allocation5], 4294966912 }
 0x29e PF: > { %s23_s23 = sadd.s32 1, %s1540_s23   ;;  %s2031_s28 = sld [smem:[#allocation17_spill]] }
 0x29f   : > { %p20_p1 = scmp.ge.s32.totalorder %s23_s23, 4   ;;  %s2032_s29 = sld [smem:[#allocation16_spill]] }
 0x2a0   : > { %s2033_s18 = smov %s1524_s19  ;;  %s2034_s19 = smov %s1528_s20 }
 0x2a1   : > { %s2036_s21 = smov %s1536_s22  ;;  %22 = sbr.rel (!%p20_p1) target bundleno = 10 (0xa), region = 116 }
 0x2a4   : > { %s2035_s20 = smov %s2031_s28 }
 0x2a5   : > { %s2037_s22 = smov %s2032_s29 }
 0x2a8   :  { %900 = vsyncpa [#allocation4], 1 }
 0x2a9   :  { %902 = vsyncpa [#allocation4 + $0x1], 1 }
 0x2aa   :  { %903 = vsyncpa [#allocation7], 1 }
 0x2ab   :  { %905 = vsyncpa [#allocation7 + $0x1], 1 }
 0x2ac   :  { %906 = vsyncpa [#allocation10], 1 }
 0x2ad   :  { %908 = vsyncpa [#allocation10 + $0x1], 1 }
 0x2ae   :  { %909 = vsyncpa [#allocation5], 1 }
 0x2af   :  { %911 = vsyncpa [#allocation5 + $0x1], 1 }

</bundles_post_ra>
